<compile_context>
chip_gen: v7x
topology: tpu7x:2x2x1
jax: 0.10.0
libtpu: 0.0.40
codegen_flags: <defaults>
</compile_context>

<pallas_src>
import functools
import math

import jax
import jax.numpy as jnp
from jax import lax
from jax.experimental import pallas as pl
from jax.experimental.pallas import tpu as pltpu

# Contract the last axis of both operands (A @ B.T) without materializing B.T.
_CONTRACT_LAST = (((1,), (1,)), ((), ()))


def _round_up(a: int, b: int) -> int:
    return (a + b - 1) // b * b


def _cdiv(a: int, b: int) -> int:
    return -(-a // b)


def _vmem_budget_bytes() -> int:
    """~56% of physical VMEM (128 MiB v5e/v6e -> ~72 MiB; 64 MiB v7x -> ~36 MiB)."""
    cap = 64 * 1024 * 1024  # conservative (v7x) fallback
    try:
        info = pltpu.get_tpu_info()
        cap = int(getattr(info, "vmem_capacity_bytes", cap) or cap)
    except Exception:
        pass
    return (cap * 9) // 16


def _resident_spec(block_shape, index_map):
    """BlockSpec for an operand whose block never changes: single-buffered.

    Default BlockSpec double-buffers every input even when its index_map is
    constant; Buffered(1) removes the duplicate copy (pure VMEM win)."""
    try:
        return pl.BlockSpec(block_shape, index_map, pipeline_mode=pl.Buffered(1))
    except Exception:  # older jax without pipeline_mode: fall back gracefully
        return pl.BlockSpec(block_shape, index_map)


# --------------------------------------------------------------------------
# K projection: K = Y @ W_K.T, computed once and reused by both main paths.
#
# NOTE: this stays a separate (tiny) pallas_call rather than a
# pl.when(program_id==0) scratch init inside the main kernel: with the row
# axis marked "parallel", v7x's second TensorCore never sees program_id(0)==0,
# so a one-shot in-kernel init would be unsound under megacore.  The flash
# path needs K in HBM anyway.
# TODO(synk): for tiny N*M, fold the projection into the main kernel (row axis
# "arbitrary") to save the extra launch + the K HBM round trip.
# --------------------------------------------------------------------------
def _k_projection_kernel(y_ref, wk_ref, k_ref):
    k_ref[...] = lax.dot_general(
        y_ref[...], wk_ref[...], _CONTRACT_LAST,
        preferred_element_type=jnp.float32,
    ).astype(k_ref.dtype)


def _project_k(y_p, wk_c, m_pad, d, d_k, vmem_limit):
    tile_m = 512 if m_pad % 512 == 0 else (256 if m_pad % 256 == 0 else 128)
    tile_m = min(tile_m, m_pad)
    return pl.pallas_call(
        _k_projection_kernel,
        out_shape=jax.ShapeDtypeStruct((m_pad, d_k), y_p.dtype),
        grid_spec=pltpu.PrefetchScalarGridSpec(
            num_scalar_prefetch=0,
            grid=(m_pad // tile_m,),
            in_specs=[
                pl.BlockSpec((tile_m, d), lambda i: (i, 0)),       # Y row tile
                _resident_spec((d_k, d), lambda i: (0, 0)),        # W_K resident
            ],
            out_specs=pl.BlockSpec((tile_m, d_k), lambda i: (i, 0)),
        ),
        compiler_params=pltpu.CompilerParams(
            dimension_semantics=("parallel",), vmem_limit_bytes=vmem_limit),
    )(y_p, wk_c)


# --------------------------------------------------------------------------
# Path 1: K fully VMEM-resident (small / moderate M).
# --------------------------------------------------------------------------
def _attention_resident_kernel(x_ref, wq_ref, k_ref, o_ref, *, m_valid, approx_recip):
    # Q_tile = X_tile @ (W_Q / sqrt(d_k)).T  (scale folded into wq).
    q = lax.dot_general(
        x_ref[...], wq_ref[...], _CONTRACT_LAST,
        preferred_element_type=jnp.float32,
    )
    # scores = Q @ K.T : contract the d_k axes directly (no explicit transpose).
    scores = lax.dot_general(
        q.astype(k_ref.dtype), k_ref[...], _CONTRACT_LAST,
        preferred_element_type=jnp.float32,
    )

    m_pad = scores.shape[-1]
    if m_valid < m_pad:  # static: mask lane-padded key columns out of the softmax
        col = lax.broadcasted_iota(jnp.int32, scores.shape, 1)
        scores = jnp.where(col < m_valid, scores, jnp.float32(-jnp.inf))

    row_max = jnp.max(scores, axis=-1, keepdims=True)
    e = jnp.exp(scores - row_max)
    denom = jnp.sum(e, axis=-1, keepdims=True)
    o_ref[...] = (e * pl.reciprocal(denom, approx=approx_recip)).astype(o_ref.dtype)


# --------------------------------------------------------------------------
# Path 2: flash-style key-axis tiling (large M).
#   Pass A: online max/sum over streamed K tiles -> per-row logsumexp.
#   Pass B: out tile = exp(scores - lse), written tile by tile.
# Both passes cache Q for the current row tile in VMEM scratch (computed at
# j==0; the key axis is "arbitrary", so j==0 is seen on every core).
# --------------------------------------------------------------------------
def _flash_lse_kernel(x_ref, wq_ref, k_ref, lse_ref, q_sc, m_sc, l_sc, *,
                      m_valid, tile_m):
    j = pl.program_id(1)

    @pl.when(j == 0)
    def _():
        q_sc[...] = lax.dot_general(
            x_ref[...], wq_ref[...], _CONTRACT_LAST,
            preferred_element_type=jnp.float32,
        ).astype(q_sc.dtype)
        m_sc[...] = jnp.full_like(m_sc, -jnp.inf)
        l_sc[...] = jnp.zeros_like(l_sc)

    s = lax.dot_general(q_sc[...], k_ref[...], _CONTRACT_LAST,
                        preferred_element_type=jnp.float32)
    if m_valid % tile_m != 0:  # static: the last key tile has padded columns
        col = j * tile_m + lax.broadcasted_iota(jnp.int32, s.shape, 1)
        s = jnp.where(col < m_valid, s, jnp.float32(-jnp.inf))

    m_new = jnp.maximum(m_sc[...], jnp.max(s, axis=-1, keepdims=True))
    alpha = jnp.exp(m_sc[...] - m_new)
    l_sc[...] = alpha * l_sc[...] + jnp.sum(jnp.exp(s - m_new), axis=-1, keepdims=True)
    m_sc[...] = m_new

    @pl.when(j == pl.num_programs(1) - 1)
    def _():
        lse_ref[...] = m_sc[...] + jnp.log(l_sc[...])


def _flash_normalize_kernel(x_ref, wq_ref, k_ref, lse_ref, o_ref, q_sc):
    j = pl.program_id(1)

    @pl.when(j == 0)
    def _():
        q_sc[...] = lax.dot_general(
            x_ref[...], wq_ref[...], _CONTRACT_LAST,
            preferred_element_type=jnp.float32,
        ).astype(q_sc.dtype)

    s = lax.dot_general(q_sc[...], k_ref[...], _CONTRACT_LAST,
                        preferred_element_type=jnp.float32)
    # Padded key columns produce harmless junk here; the wrapper slices them off.
    o_ref[...] = jnp.exp(s - lse_ref[...]).astype(o_ref.dtype)


# --------------------------------------------------------------------------
# Wrapper
# --------------------------------------------------------------------------
def attention_mechanism(x, y, w_q, w_k, *, tile_n=512, tile_m=512,
                        matmul_dtype=jnp.bfloat16, out_dtype=jnp.bfloat16,
                        approx_softmax_recip=True, force_path=None):
    """softmax((x @ w_q.T) @ (y @ w_k.T).T / sqrt(d_k)) of shape (N, M).

    x: (N, D), y: (M, D), w_q / w_k: (d_k, D) in PyTorch Linear layout.
    force_path: None (auto) | "resident" | "flash".
    """
    n, d = x.shape
    m, d_y = y.shape
    d_k, d_wq = w_q.shape
    assert d == d_y == d_wq == w_k.shape[1] and d_k == w_k.shape[0]

    scale = 1.0 / math.sqrt(float(d_k))
    mm_bytes = jnp.dtype(matmul_dtype).itemsize
    out_bytes = jnp.dtype(out_dtype).itemsize
    budget = _vmem_budget_bytes()

    # Fold the 1/sqrt(d_k) score scale into W_Q; keep PyTorch (d_k, D) layout.
    wq_c = (jnp.asarray(w_q, jnp.float32) * scale).astype(matmul_dtype)
    wk_c = jnp.asarray(w_k, matmul_dtype)

    def resident_footprint(tn, mp):
        return (2 * tn * d * mm_bytes          # X tile (double-buffered)
                + d_k * d * mm_bytes           # W_Q (Buffered(1))
                + mp * d_k * mm_bytes          # resident K (Buffered(1))
                + 2 * tn * mp * out_bytes      # output tile (double-buffered)
                + 2 * tn * mp * 4              # live f32 scores / exp temporaries
                + (2 << 20))                   # slack for compiler scratch

    def choose_row_tiling(footprint):
        # Large tiles first; >=2 "parallel" steps when N permits (v7x megacore);
        # shrink until the per-step VMEM footprint fits the budget.
        ntiles = max(1, _cdiv(n, max(8, tile_n)))
        if n >= 512:
            ntiles = max(ntiles, 2)
        tn = _round_up(_cdiv(n, ntiles), 8)
        while footprint(tn) > budget and tn > 8:
            ntiles *= 2
            tn = _round_up(_cdiv(n, ntiles), 8)
        return tn, _round_up(n, tn)

    m_pad_res = _round_up(m, 128)
    probe_tn = min(256, _round_up(n, 8))   # need at least a 256-row tile to fit
    use_resident = resident_footprint(probe_tn, m_pad_res) <= budget
    if force_path == "resident":
        use_resident = True
    elif force_path == "flash":
        use_resident = False

    if use_resident:
        # -------- resident-K path --------
        m_pad = m_pad_res
        tn, n_pad = choose_row_tiling(lambda t: resident_footprint(t, m_pad))
        x_p = jnp.pad(jnp.asarray(x, matmul_dtype), ((0, n_pad - n), (0, 0)))
        y_p = jnp.pad(jnp.asarray(y, matmul_dtype), ((0, m_pad - m), (0, 0)))
        k = _project_k(y_p, wk_c, m_pad, d, d_k, budget)

        out_p = pl.pallas_call(
            functools.partial(_attention_resident_kernel, m_valid=m,
                              approx_recip=approx_softmax_recip),
            out_shape=jax.ShapeDtypeStruct((n_pad, m_pad), out_dtype),
            grid_spec=pltpu.PrefetchScalarGridSpec(
                num_scalar_prefetch=0,
                grid=(n_pad // tn,),
                in_specs=[
                    pl.BlockSpec((tn, d), lambda i: (i, 0)),         # X rows stream
                    _resident_spec((d_k, d), lambda i: (0, 0)),      # W_Q resident
                    _resident_spec((m_pad, d_k), lambda i: (0, 0)),  # K resident
                ],
                out_specs=pl.BlockSpec((tn, m_pad), lambda i: (i, 0)),
            ),
            compiler_params=pltpu.CompilerParams(
                dimension_semantics=("parallel",), vmem_limit_bytes=budget),
        )(x_p, wq_c, k)
        return out_p[:n, :m]

    # -------- flash path: stream K tiles, two passes --------
    tm = min(_round_up(max(128, tile_m), 128), _round_up(m, 128))
    m_pad = _round_up(m, tm)

    def flash_footprint(tn):
        return (2 * tn * d * mm_bytes          # X tile
                + d_k * d * mm_bytes           # W_Q resident
                + 2 * tm * d_k * mm_bytes      # K tile (double-buffered)
                + 2 * tn * tm * out_bytes      # output tile (pass B)
                + tn * d_k * mm_bytes          # Q scratch
                + 4 * tn * 4                   # m/l scratch + lse tile
                + 2 * tn * tm * 4              # f32 scores / exp temporaries
                + (2 << 20))

    tn, n_pad = choose_row_tiling(flash_footprint)
    x_p = jnp.pad(jnp.asarray(x, matmul_dtype), ((0, n_pad - n), (0, 0)))
    y_p = jnp.pad(jnp.asarray(y, matmul_dtype), ((0, m_pad - m), (0, 0)))
    k = _project_k(y_p, wk_c, m_pad, d, d_k, budget)
    n_tiles, m_tiles = n_pad // tn, m_pad // tm

    # Pass A: per-row logsumexp with online max/sum over streamed K tiles.
    lse = pl.pallas_call(
        functools.partial(_flash_lse_kernel, m_valid=m, tile_m=tm),
        out_shape=jax.ShapeDtypeStruct((n_pad, 1), jnp.float32),
        grid_spec=pltpu.PrefetchScalarGridSpec(
            num_scalar_prefetch=0,
            grid=(n_tiles, m_tiles),
            in_specs=[
                pl.BlockSpec((tn, d), lambda i, j: (i, 0)),
                _resident_spec((d_k, d), lambda i, j: (0, 0)),
                pl.BlockSpec((tm, d_k), lambda i, j: (j, 0)),
            ],
            out_specs=pl.BlockSpec((tn, 1), lambda i, j: (i, 0)),
            scratch_shapes=[pltpu.VMEM((tn, d_k), matmul_dtype),
                            pltpu.VMEM((tn, 1), jnp.float32),
                            pltpu.VMEM((tn, 1), jnp.float32)],
        ),
        compiler_params=pltpu.CompilerParams(
            dimension_semantics=("parallel", "arbitrary"),
            vmem_limit_bytes=budget),
    )(x_p, wq_c, k)

    # Pass B: normalized softmax tiles written lane-dense, dtype out_dtype.
    out_p = pl.pallas_call(
        _flash_normalize_kernel,
        out_shape=jax.ShapeDtypeStruct((n_pad, m_pad), out_dtype),
        grid_spec=pltpu.PrefetchScalarGridSpec(
            num_scalar_prefetch=0,
            grid=(n_tiles, m_tiles),
            in_specs=[
                pl.BlockSpec((tn, d), lambda i, j: (i, 0)),
                _resident_spec((d_k, d), lambda i, j: (0, 0)),
                pl.BlockSpec((tm, d_k), lambda i, j: (j, 0)),
                pl.BlockSpec((tn, 1), lambda i, j: (i, 0)),
            ],
            out_specs=pl.BlockSpec((tn, tm), lambda i, j: (i, j)),
            scratch_shapes=[pltpu.VMEM((tn, d_k), matmul_dtype)],
        ),
        compiler_params=pltpu.CompilerParams(
            dimension_semantics=("parallel", "arbitrary"),
            vmem_limit_bytes=budget),
    )(x_p, wq_c, k, lse)
    return out_p[:n, :m]


def _reference(x, y, w_q, w_k):
    q = x @ w_q.T
    k = y @ w_k.T
    scores = (q @ k.T) / jnp.sqrt(jnp.float32(q.shape[-1]))
    return jax.nn.softmax(scores, axis=-1)


if __name__ == "__main__":
    input_dim = 512   # fixed by the module
    d_k = 128         # fixed by the module

    key = jax.random.PRNGKey(0)
    kx, ky, kwq, kwk = jax.random.split(key, 4)
    # Deterministic "Linear" weights, PyTorch layout (out_features, in_features).
    w_q = jax.random.normal(kwq, (d_k, input_dim), dtype=jnp.float32) * 0.02
    w_k = jax.random.normal(kwk, (d_k, input_dim), dtype=jnp.float32) * 0.02

    x_big = jax.random.normal(kx, (320, input_dim), dtype=jnp.float32)
    y_big = jax.random.normal(ky, (320, input_dim), dtype=jnp.float32)

    # Case 1: resident path, default fast config (bf16 matmuls, f32 accum,
    # approx EUP reciprocal, bf16 output).
    n1, m1 = 256, 128
    x1, y1 = x_big[:n1], y_big[:m1]
    out1 = jax.block_until_ready(attention_mechanism(x1, y1, w_q, w_k))
    ref1 = _reference(x1, y1, w_q, w_k)
    assert out1.shape == (n1, m1)
    o1 = out1.astype(jnp.float32)
    assert jnp.allclose(o1, ref1, atol=2e-2, rtol=2e-2), "bf16 resident path mismatch"
    assert jnp.allclose(jnp.sum(o1, axis=-1), 1.0, atol=2e-2), "rows must sum to ~1"

    # Case 2: ragged shapes (row padding + masked lane padding), exact f32 path.
    n2, m2 = 40, 48
    out2 = jax.block_until_ready(
        attention_mechanism(x_big[:n2], y_big[:m2], w_q, w_k,
                            matmul_dtype=jnp.float32, out_dtype=jnp.float32,
                            approx_softmax_recip=False))
    ref2 = _reference(x_big[:n2], y_big[:m2], w_q, w_k)
    assert out2.shape == (n2, m2)
    assert jnp.allclose(out2, ref2, atol=1e-4, rtol=1e-4), "f32 resident path mismatch"
    assert jnp.allclose(jnp.sum(out2, axis=-1), 1.0, atol=1e-4), "rows must sum to 1"

    # Case 3: flash (streamed-K) path forced at small shapes, exact f32 config,
    # multi-tile key axis (tile_m=128 -> 3 tiles) with masked key padding.
    n3, m3 = 300, 300
    out3 = jax.block_until_ready(
        attention_mechanism(x_big[:n3], y_big[:m3], w_q, w_k,
                            tile_m=128, force_path="flash",
                            matmul_dtype=jnp.float32, out_dtype=jnp.float32))
    ref3 = _reference(x_big[:n3], y_big[:m3], w_q, w_k)
    assert out3.shape == (n3, m3)
    assert jnp.allclose(out3, ref3, atol=1e-4, rtol=1e-4), "f32 flash path mismatch"
    assert jnp.allclose(jnp.sum(out3, axis=-1), 1.0, atol=1e-4), "flash rows must sum to 1"

    # Case 4: flash path with the default fast config (bf16 matmuls / output).
    out4 = jax.block_until_ready(
        attention_mechanism(x_big[:n3], y_big[:m3], w_q, w_k,
                            tile_m=128, force_path="flash"))
    o4 = out4.astype(jnp.float32)
    assert out4.shape == (n3, m3)
    assert jnp.allclose(o4, ref3, atol=2e-2, rtol=2e-2), "bf16 flash path mismatch"
    assert jnp.allclose(jnp.sum(o4, axis=-1), 1.0, atol=2e-2), "flash rows must sum to ~1"

    print("KERNEL_OK")
</pallas_src>

<mosaic_0001>
module attributes {stable_mosaic.version = 11 : i64} {
  func.func @_k_projection_kernel(%arg0: i32, %arg1: memref<128x512xbf16, #tpu.memory_space<vmem>>, %arg2: memref<128x512xbf16, #tpu.memory_space<vmem>>, %arg3: memref<128x128xbf16, #tpu.memory_space<vmem>>) attributes {dimension_semantics = [#tpu.dimension_semantics<parallel>], iteration_bounds = array<i64: 1>, scalar_prefetch = 0 : i64, scratch_operands = 0 : i64, tpu.core_type = #tpu.core_type<tc>, window_params = [{transform_indices = @transform_0, window_bounds = array<i64: 128, 512>}, {pipeline_mode = #tpu.pipeline_mode<synchronous>, transform_indices = @transform_1, window_bounds = array<i64: 128, 512>}, {transform_indices = @transform_2, window_bounds = array<i64: 128, 128>}]} {
    %c0 = arith.constant 0 : index
    %c0_0 = arith.constant 0 : index
    %0 = vector.load %arg1[%c0, %c0_0] : memref<128x512xbf16, #tpu.memory_space<vmem>>, vector<128x512xbf16>
    %c0_1 = arith.constant 0 : index
    %c0_2 = arith.constant 0 : index
    %1 = vector.load %arg2[%c0_1, %c0_2] : memref<128x512xbf16, #tpu.memory_space<vmem>>, vector<128x512xbf16>
    %cst = arith.constant dense<0.000000e+00> : vector<128x128xf32>
    %2 = tpu.matmul %0, %1, %cst {dimension_numbers = #tpu.dot_dimension_numbers<[1], [1], [0], [0], [0, 0, 1, 0], [], []>} : vector<128x512xbf16>, vector<128x512xbf16>, vector<128x128xf32> -> vector<128x128xf32>
    %3 = arith.truncf %2 : vector<128x128xf32> to vector<128x128xbf16>
    %c0_3 = arith.constant 0 : index
    %c0_4 = arith.constant 0 : index
    %4 = vector.load %arg3[%c0_3, %c0_4] : memref<128x128xbf16, #tpu.memory_space<vmem>>, vector<128x128xbf16>
    tpu.vector_store %arg3[%c0_3, %c0_4], %3 {strides = array<i32>} : memref<128x128xbf16, #tpu.memory_space<vmem>>, vector<128x128xbf16>,
    return
  }
  func.func @transform_0(%arg0: i32) -> (i32, i32) {
    %c0_i32 = arith.constant 0 : i32
    %c0_i32_0 = arith.constant 0 : i32
    return %arg0, %c0_i32 : i32, i32
  }
  func.func @transform_1(%arg0: i32) -> (i32, i32) {
    %c0_i32 = arith.constant 0 : i32
    %c0_i32_0 = arith.constant 0 : i32
    %c0_i32_1 = arith.constant 0 : i32
    return %c0_i32, %c0_i32_0 : i32, i32
  }
  func.func @transform_2(%arg0: i32) -> (i32, i32) {
    %c0_i32 = arith.constant 0 : i32
    %c0_i32_0 = arith.constant 0 : i32
    return %arg0, %c0_i32 : i32, i32
  }
}

</mosaic_0001>

<bundles_post_ra>
// kernel: tpu_custom_call.1
= control target key start
LH: loop header
LB: loop body
LE: loop exit
PB: predicated region body
PF: predicated region fallthrough
CT: control target
= control target key end

     0   :  { %7 = vsyncpa [#allocation3], 0  ;;  %s1109_s0 = inlined_call_operand.hbm [shape: bf16[128,512], index: 0, kind: input, shape index: {}]   ;;  %s1110_s1 = inlined_call_operand.hbm [shape: bf16[128,512], index: 1, kind: input, shape index: {}]   ;;  %s1111_s2 = inlined_call_operand.hbm [shape: bf16[128,128], index: 2, kind: output, shape index: {}]  }
   0x1   :  { %8 = vsyncpa [#allocation6], 0 }
   0x2   :  { %9 = vsyncpa [#allocation4], 0  ;;  %s1051_s9 = smov [#allocation2]   ;;  %s979_s13 = scalar_lea.hbm %s1109_s0, 4096 }
   0x3   :  { %s15_s10 = sshll.u32 %s1051_s9, 4  ;;  %p980_p0 = scmp.ne.s32.totalorder %s1109_s0, %s979_s13  ;;  %s16_s10 = int_to_ptr.vmem [resolvable:$true] %s15_s10 }
   0x4   :  { %p983_p1 = scmp.lt.u32.totalorder %s979_s13, %s1109_s0 }
   0x6   :  { %p985_p2 = pnand %p983_p1, %p980_p0 }
   0x8   :  { %988 = shalt.err (!%p985_p2)
}
   0x9   :  { %s989_s18 = scalar_lea.vmem %s16_s10, 4096  ;;  %p994_p4 = scmp.lt.s32.totalorder %s16_s10, %s16_s10 }
   0xa   :  { %p990_p3 = scmp.ne.s32.totalorder %s16_s10, %s989_s18  ;;  %p995_p5 = scmp.lt.s32.totalorder %s989_s18, %s989_s18 }
   0xc   :  { %p996_p6 = por %p995_p5, %p994_p4 }
   0xe   :  { %p997_p7 = pnand %p996_p6, %p990_p3 }
  0x10   :  { %1000 = shalt.err (!%p997_p7)
}
  0x11   :  { %s1052_s19 = smov 256   ;;  %s1053_s20 = smov 16  }
  0x12   :  { %21 = dma.hbm_to_vmem [thread:$0]  %s1109_s0, 4096, %s16_s10, [#allocation3], %s1052_s19, %s1052_s19, %s1053_s20  }
  0x13   :  { %s1054_s23 = smov [#allocation5]   ;;  %s1001_s27 = scalar_lea.hbm %s1110_s1, 4096 }
  0x14   :  { %s27_s24 = sshll.u32 %s1054_s23, 4  ;;  %p1002_p8 = scmp.ne.s32.totalorder %s1110_s1, %s1001_s27  ;;  %s28_s24 = int_to_ptr.vmem [resolvable:$true] %s27_s24 }
  0x15   :  { %p1005_p9 = scmp.lt.u32.totalorder %s1001_s27, %s1110_s1 }
  0x17   :  { %p1007_p10 = pnand %p1005_p9, %p1002_p8 }
  0x19   :  { %1010 = shalt.err (!%p1007_p10)
}
  0x1a   :  { %s1011_s4 = scalar_lea.vmem %s28_s24, 4096  ;;  %p1016_p12 = scmp.lt.s32.totalorder %s28_s24, %s28_s24 }
  0x1b   :  { %p1012_p11 = scmp.ne.s32.totalorder %s28_s24, %s1011_s4  ;;  %p1017_p13 = scmp.lt.s32.totalorder %s1011_s4, %s1011_s4 }
  0x1d   :  { %p1018_p0 = por %p1017_p13, %p1016_p12 }
  0x1f   :  { %p1019_p1 = pnand %p1018_p0, %p1012_p11 }
  0x21   :  { %1022 = shalt.err (!%p1019_p1)
}
  0x22   :  { %33 = dma.hbm_to_vmem [thread:$0]  %s1110_s1, 4096, %s28_s24, [#allocation6], %s1052_s19, %s1052_s19, %s1053_s20  }
  0x23   :  { %1045 = dma.done.wait [#allocation3], 4096  }
  0x24   :  { %1046 = vsyncadd [#allocation3], 4294963200 }
  0x25   :  { %1047 = dma.done.wait [#allocation6], 4096  }
  0x26   :  { %1048 = vsyncadd [#allocation6], 4294963200  ;;  %v883_v0 = vld [vmem:[#allocation5 + $0x4] ss:$16 sps:$4 sm:$0xff]   ;;  %v885_v1 = vld [vmem:[#allocation5 + $0xc] ss:$16 sps:$4 sm:$0xff]  }
  0x27   :  { %425 = vmatprep.subr.bf16.mxu1 %v883_v0  ;;  %v887_v2 = vld [vmem:[#allocation5] ss:$16 sps:$4 sm:$0xff]   ;;  %v888_v3 = vld [vmem:[#allocation5 + $0x8] ss:$16 sps:$4 sm:$0xff]   ;;  %522 = vmatprep.subr.bf16.mxu0 %v885_v1  ;;  %v889_v4 = vld [vmem:[#allocation5 + $0x24] ss:$16 sps:$4 sm:$0xff]  }
  0x28   :  { %426 = vmatpush1.bf16.xpose.msra.mxu1 %v887_v2  ;;  %523 = vmatpush1.bf16.xpose.msra.mxu0 %v888_v3  ;;  %v891_v5 = vld [vmem:[#allocation5 + $0x2c] ss:$16 sps:$4 sm:$0xff]   ;;  %v893_v6 = vld [vmem:[#allocation5 + $0x20] ss:$16 sps:$4 sm:$0xff]   ;;  %v894_v7 = vld [vmem:[#allocation5 + $0x28] ss:$16 sps:$4 sm:$0xff]  }
  0x29   :  { %427 = vmatprep.subr.bf16.mxu1 %v889_v4  ;;  %524 = vmatprep.subr.bf16.mxu0 %v891_v5  ;;  %v895_v8 = vld [vmem:[#allocation5 + $0x44] ss:$16 sps:$4 sm:$0xff]   ;;  %v897_v9 = vld [vmem:[#allocation5 + $0x4c] ss:$16 sps:$4 sm:$0xff]   ;;  %v899_v10 = vld [vmem:[#allocation5 + $0x40] ss:$16 sps:$4 sm:$0xff]  }
  0x2a   :  { %v900_v11 = vld [vmem:[#allocation5 + $0x48] ss:$16 sps:$4 sm:$0xff]   ;;  %v901_v12 = vld [vmem:[#allocation5 + $0x64] ss:$16 sps:$4 sm:$0xff]   ;;  %v903_v13 = vld [vmem:[#allocation5 + $0x6c] ss:$16 sps:$4 sm:$0xff]  }
  0x2b   :  { %v905_v14 = vld [vmem:[#allocation5 + $0x60] ss:$16 sps:$4 sm:$0xff]   ;;  %v933_v15 = vld [vmem:[#allocation2 + $0x4] ss:$16 sps:$4 sm:$0xff]   ;;  %v906_v16 = vld [vmem:[#allocation5 + $0x68] ss:$16 sps:$4 sm:$0xff]  }
  0x2c   :  { %v936_v17 = vld [vmem:[#allocation2 + $0xc] ss:$16 sps:$4 sm:$0xff]   ;;  %v907_v18 = vld [vmem:[#allocation5 + $0x84] ss:$16 sps:$4 sm:$0xff]   ;;  %457 = vmatprep.mubr.bf16.mxu1 %v933_v15  ;;  %v911_v20 = vld [vmem:[#allocation5 + $0x80] ss:$16 sps:$4 sm:$0xff]  }
  0x2d   :  { %v909_v19 = vld [vmem:[#allocation5 + $0x8c] ss:$16 sps:$4 sm:$0xff]   ;;  %554 = vmatprep.mubr.bf16.mxu0 %v936_v17  ;;  %v912_v21 = vld [vmem:[#allocation5 + $0x88] ss:$16 sps:$4 sm:$0xff]   ;;  %v913_v22 = vld [vmem:[#allocation5 + $0xa4] ss:$16 sps:$4 sm:$0xff]  }
  0x2e   :  { %v915_v23 = vld [vmem:[#allocation5 + $0xac] ss:$16 sps:$4 sm:$0xff]   ;;  %v917_v24 = vld [vmem:[#allocation5 + $0xa0] ss:$16 sps:$4 sm:$0xff]   ;;  %v918_v25 = vld [vmem:[#allocation5 + $0xa8] ss:$16 sps:$4 sm:$0xff]  }
  0x2f   :  { %v919_v26 = vld [vmem:[#allocation5 + $0xc4] ss:$16 sps:$4 sm:$0xff]   ;;  %v921_v27 = vld [vmem:[#allocation5 + $0xcc] ss:$16 sps:$4 sm:$0xff]   ;;  %v923_v28 = vld [vmem:[#allocation5 + $0xc0] ss:$16 sps:$4 sm:$0xff]  }
  0x30   :  { %428 = vmatpush1.bf16.xpose.msra.mxu1 %v893_v6  ;;  %525 = vmatpush1.bf16.xpose.msra.mxu0 %v894_v7  ;;  %v924_v29 = vld [vmem:[#allocation5 + $0xc8] ss:$16 sps:$4 sm:$0xff]   ;;  %v925_v30 = vld [vmem:[#allocation5 + $0xe4] ss:$16 sps:$4 sm:$0xff]   ;;  %v927_v31 = vld [vmem:[#allocation5 + $0xec] ss:$16 sps:$4 sm:$0xff]  }
  0x31   :  { %429 = vmatprep.subr.bf16.mxu1 %v895_v8  ;;  %526 = vmatprep.subr.bf16.mxu0 %v897_v9  ;;  %v929_v32 = vld [vmem:[#allocation5 + $0xe0] ss:$16 sps:$4 sm:$0xff]   ;;  %v930_v33 = vld [vmem:[#allocation5 + $0xe8] ss:$16 sps:$4 sm:$0xff]   ;;  %v937_v36 = vld [vmem:[#allocation2 + $0x24] ss:$16 sps:$4 sm:$0xff]  }
  0x32   :  { %v931_v34 = vld [vmem:[#allocation2] ss:$16 sps:$4 sm:$0xff]   ;;  %v934_v35 = vld [vmem:[#allocation2 + $0x8] ss:$16 sps:$4 sm:$0xff]   ;;  %v939_v37 = vld [vmem:[#allocation2 + $0x2c] ss:$16 sps:$4 sm:$0xff]  }
  0x33   :  { %v941_v38 = vld [vmem:[#allocation2 + $0x20] ss:$16 sps:$4 sm:$0xff]   ;;  %v942_v39 = vld [vmem:[#allocation2 + $0x28] ss:$16 sps:$4 sm:$0xff]   ;;  %v943_v40 = vld [vmem:[#allocation2 + $0x44] ss:$16 sps:$4 sm:$0xff]  }
  0x34   :  { %v945_v41 = vld [vmem:[#allocation2 + $0x4c] ss:$16 sps:$4 sm:$0xff]   ;;  %v947_v42 = vld [vmem:[#allocation2 + $0x40] ss:$16 sps:$4 sm:$0xff]   ;;  %v948_v43 = vld [vmem:[#allocation2 + $0x48] ss:$16 sps:$4 sm:$0xff]  }
  0x35   :  { %v949_v44 = vld [vmem:[#allocation2 + $0x64] ss:$16 sps:$4 sm:$0xff]   ;;  %v951_v45 = vld [vmem:[#allocation2 + $0x6c] ss:$16 sps:$4 sm:$0xff]   ;;  %v953_v46 = vld [vmem:[#allocation2 + $0x60] ss:$16 sps:$4 sm:$0xff]  }
  0x36   :  { %v954_v47 = vld [vmem:[#allocation2 + $0x68] ss:$16 sps:$4 sm:$0xff]   ;;  %v955_v48 = vld [vmem:[#allocation2 + $0x84] ss:$16 sps:$4 sm:$0xff]   ;;  %v957_v49 = vld [vmem:[#allocation2 + $0x8c] ss:$16 sps:$4 sm:$0xff]  }
  0x37   :  { %v959_v50 = vld [vmem:[#allocation2 + $0x80] ss:$16 sps:$4 sm:$0xff]   ;;  %v960_v51 = vld [vmem:[#allocation2 + $0x88] ss:$16 sps:$4 sm:$0xff]   ;;  %v961_v52 = vld [vmem:[#allocation2 + $0xa4] ss:$16 sps:$4 sm:$0xff]  }
  0x38   :  { %430 = vmatpush1.bf16.xpose.msra.mxu1 %v899_v10  ;;  %527 = vmatpush1.bf16.xpose.msra.mxu0 %v900_v11  ;;  %v963_v53 = vld [vmem:[#allocation2 + $0xac] ss:$16 sps:$4 sm:$0xff]   ;;  %v965_v54 = vld [vmem:[#allocation2 + $0xa0] ss:$16 sps:$4 sm:$0xff]   ;;  %v966_v55 = vld [vmem:[#allocation2 + $0xa8] ss:$16 sps:$4 sm:$0xff]  }
  0x39   :  { %431 = vmatprep.subr.bf16.mxu1 %v901_v12  ;;  %528 = vmatprep.subr.bf16.mxu0 %v903_v13  ;;  %v967_v56 = vld [vmem:[#allocation2 + $0xc4] ss:$16 sps:$4 sm:$0xff]   ;;  %v969_v57 = vld [vmem:[#allocation2 + $0xcc] ss:$16 sps:$4 sm:$0xff]   ;;  %v971_v58 = vld [vmem:[#allocation2 + $0xc0] ss:$16 sps:$4 sm:$0xff]  }
  0x3a   :  { %v972_v59 = vld [vmem:[#allocation2 + $0xc8] ss:$16 sps:$4 sm:$0xff]   ;;  %v973_v60 = vld [vmem:[#allocation2 + $0xe4] ss:$16 sps:$4 sm:$0xff]   ;;  %v975_v61 = vld [vmem:[#allocation2 + $0xec] ss:$16 sps:$4 sm:$0xff]  }
  0x3b   :  { %v977_v62 = vld [vmem:[#allocation2 + $0xe0] ss:$16 sps:$4 sm:$0xff]   ;;  %v978_v63 = vld [vmem:[#allocation2 + $0xe8] ss:$16 sps:$4 sm:$0xff]   ;;  %s1055_s1 = smov [#allocation7]  }
  0x3c   :  { %s704_s6 = sshll.u32 %s1055_s1, 4  ;;  %s705_s6 = int_to_ptr.vmem [resolvable:$true] %s704_s6 }
  0x3d   :  { %s1023_s7 = scalar_lea.vmem %s705_s6, 1024  ;;  %p1028_p3 = scmp.lt.s32.totalorder %s705_s6, %s705_s6 }
  0x3e   :  { %p1024_p2 = scmp.ne.s32.totalorder %s705_s6, %s1023_s7  ;;  %p1029_p4 = scmp.lt.s32.totalorder %s1023_s7, %s1023_s7 }
  0x40   :  { %432 = vmatpush1.bf16.xpose.msra.mxu1 %v905_v14  ;;  %529 = vmatpush1.bf16.xpose.msra.mxu0 %v906_v16  ;;  %p1030_p5 = por %p1029_p4, %p1028_p3 }
  0x41   :  { %433 = vmatprep.subr.bf16.mxu1 %v907_v18  ;;  %530 = vmatprep.subr.bf16.mxu0 %v909_v19 }
  0x42   :  { %p1031_p6 = pnand %p1030_p5, %p1024_p2 }
  0x48   :  { %434 = vmatpush1.bf16.xpose.msra.mxu1 %v911_v20  ;;  %531 = vmatpush1.bf16.xpose.msra.mxu0 %v912_v21 }
  0x49   :  { %435 = vmatprep.subr.bf16.mxu1 %v913_v22  ;;  %532 = vmatprep.subr.bf16.mxu0 %v915_v23 }
  0x50   :  { %436 = vmatpush1.bf16.xpose.msra.mxu1 %v917_v24  ;;  %533 = vmatpush1.bf16.xpose.msra.mxu0 %v918_v25 }
  0x51   :  { %437 = vmatprep.subr.bf16.mxu1 %v919_v26  ;;  %534 = vmatprep.subr.bf16.mxu0 %v921_v27 }
  0x58   :  { %438 = vmatpush1.bf16.xpose.msra.mxu1 %v923_v28  ;;  %535 = vmatpush1.bf16.xpose.msra.mxu0 %v924_v29 }
  0x59   :  { %439 = vmatprep.subr.bf16.mxu1 %v925_v30  ;;  %536 = vmatprep.subr.bf16.mxu0 %v927_v31 }
  0x60   :  { %440 = vmatpush1.bf16.xpose.msra.mxu1 %v929_v32  ;;  %537 = vmatpush1.bf16.xpose.msra.mxu0 %v930_v33 }
  0x67   :  { %458 = vmatmul.mubr.bf16.vlgmr.msra.gmra.mrb[0].mxu1 %v931_v34  ;;  %555 = vmatmul.mubr.bf16.vlgmr.msra.gmra.mrb[0].mxu0 %v934_v35 }
  0x68   :  { %465 = vmatprep.mubr.bf16.mxu1 %v937_v36  ;;  %562 = vmatprep.mubr.bf16.mxu0 %v939_v37 }
  0x6f   :  { %466 = vmatmul.mubr.bf16.gmra.mrb[4].mxu1 %v941_v38  ;;  %563 = vmatmul.mubr.bf16.gmra.mrb[4].mxu0 %v942_v39 }
  0x70   :  { %473 = vmatprep.mubr.bf16.mxu1 %v943_v40  ;;  %570 = vmatprep.mubr.bf16.mxu0 %v945_v41 }
  0x77   :  { %474 = vmatmul.mubr.bf16.gmra.mrb[8].mxu1 %v947_v42  ;;  %571 = vmatmul.mubr.bf16.gmra.mrb[8].mxu0 %v948_v43 }
  0x78   :  { %481 = vmatprep.mubr.bf16.mxu1 %v949_v44  ;;  %578 = vmatprep.mubr.bf16.mxu0 %v951_v45 }
  0x7f   :  { %482 = vmatmul.mubr.bf16.gmra.mrb[12].mxu1 %v953_v46  ;;  %579 = vmatmul.mubr.bf16.gmra.mrb[12].mxu0 %v954_v47 }
  0x80   :  { %489 = vmatprep.mubr.bf16.mxu1 %v955_v48  ;;  %586 = vmatprep.mubr.bf16.mxu0 %v957_v49 }
  0x87   :  { %490 = vmatmul.mubr.bf16.gmra.mrb[16].mxu1 %v959_v50  ;;  %587 = vmatmul.mubr.bf16.gmra.mrb[16].mxu0 %v960_v51 }
  0x88   :  { %497 = vmatprep.mubr.bf16.mxu1 %v961_v52  ;;  %594 = vmatprep.mubr.bf16.mxu0 %v963_v53 }
  0x8f   :  { %498 = vmatmul.mubr.bf16.gmra.mrb[20].mxu1 %v965_v54  ;;  %595 = vmatmul.mubr.bf16.gmra.mrb[20].mxu0 %v966_v55 }
  0x90   :  { %505 = vmatprep.mubr.bf16.mxu1 %v967_v56  ;;  %602 = vmatprep.mubr.bf16.mxu0 %v969_v57 }
  0x97   :  { %506 = vmatmul.mubr.bf16.gmra.mrb[24].mxu1 %v971_v58  ;;  %603 = vmatmul.mubr.bf16.gmra.mrb[24].mxu0 %v972_v59 }
  0x98   :  { %513 = vmatprep.mubr.bf16.mxu1 %v973_v60  ;;  %610 = vmatprep.mubr.bf16.mxu0 %v975_v61 }
  0x9f   :  { %514 = vmatmul.mubr.bf16.gmra.mrb[28].mxu1 %v977_v62  ;;  %611 = vmatmul.mubr.bf16.gmra.mrb[28].mxu0 %v978_v63 }
 0x13a   :  { %v459_v0 = vpop.f32.mrb[0].mxu1  ;;  %v556_v1 = vpop.f32.mrb[0].mxu0 }
 0x13b   :  { %v557_v2 = vadd.f32 %v556_v1, %v459_v0  ;;  %v461_v3 = vpop.f32.mrb[1].mxu1  ;;  %v558_v4 = vpop.f32.mrb[1].mxu0 }
 0x13c   :  { %v462_v5 = vpop.f32.mrb[2].mxu1  ;;  %v559_v6 = vpop.f32.mrb[2].mxu0 }
 0x13d   :  { %v560_v7 = vadd.f32 %v559_v6, %v462_v5  ;;  %v464_v8 = vpop.f32.mrb[3].mxu1  ;;  %v561_v9 = vpop.f32.mrb[3].mxu0 }
 0x13f   :  { %v816_v10 = vpack.c.bf16 %v560_v7, %v557_v2 }
 0x141   :  { %817 = vst [vmem:[#allocation7] sm:$0xff] %v816_v10  }
 0x142   :  { %v467_v11 = vpop.f32.mrb[4].mxu1  ;;  %v564_v12 = vpop.f32.mrb[4].mxu0 }
 0x143   :  { %v565_v13 = vadd.f32 %v564_v12, %v467_v11  ;;  %v469_v14 = vpop.f32.mrb[5].mxu1  ;;  %v566_v15 = vpop.f32.mrb[5].mxu0 }
 0x144   :  { %v470_v16 = vpop.f32.mrb[6].mxu1  ;;  %v567_v17 = vpop.f32.mrb[6].mxu0 }
 0x145   :  { %v568_v18 = vadd.f32 %v567_v17, %v470_v16  ;;  %v472_v19 = vpop.f32.mrb[7].mxu1  ;;  %v569_v20 = vpop.f32.mrb[7].mxu0 }
 0x147   :  { %v821_v21 = vpack.c.bf16 %v568_v18, %v565_v13 }
 0x149   :  { %853 = vst [vmem:[#allocation7 + $0x8] sm:$0xff] %v821_v21  }
 0x14a   :  { %v475_v22 = vpop.f32.mrb[8].mxu1  ;;  %v572_v23 = vpop.f32.mrb[8].mxu0 }
 0x14b   :  { %v573_v24 = vadd.f32 %v572_v23, %v475_v22  ;;  %v477_v25 = vpop.f32.mrb[9].mxu1  ;;  %v574_v26 = vpop.f32.mrb[9].mxu0 }
 0x14c   :  { %v478_v27 = vpop.f32.mrb[10].mxu1  ;;  %v575_v28 = vpop.f32.mrb[10].mxu0 }
 0x14d   :  { %v576_v29 = vadd.f32 %v575_v28, %v478_v27  ;;  %v480_v30 = vpop.f32.mrb[11].mxu1  ;;  %v577_v31 = vpop.f32.mrb[11].mxu0 }
 0x14f   :  { %v826_v32 = vpack.c.bf16 %v576_v29, %v573_v24 }
 0x151   :  { %854 = vst [vmem:[#allocation7 + $0x10] sm:$0xff] %v826_v32  }
 0x152   :  { %v483_v33 = vpop.f32.mrb[12].mxu1  ;;  %v580_v34 = vpop.f32.mrb[12].mxu0 }
 0x153   :  { %v581_v35 = vadd.f32 %v580_v34, %v483_v33  ;;  %v485_v36 = vpop.f32.mrb[13].mxu1  ;;  %v582_v37 = vpop.f32.mrb[13].mxu0 }
 0x154   :  { %v486_v38 = vpop.f32.mrb[14].mxu1  ;;  %v583_v39 = vpop.f32.mrb[14].mxu0 }
 0x155   :  { %v584_v40 = vadd.f32 %v583_v39, %v486_v38  ;;  %v488_v41 = vpop.f32.mrb[15].mxu1  ;;  %v585_v42 = vpop.f32.mrb[15].mxu0 }
 0x157   :  { %v831_v43 = vpack.c.bf16 %v584_v40, %v581_v35 }
 0x159   :  { %855 = vst [vmem:[#allocation7 + $0x18] sm:$0xff] %v831_v43  }
 0x15a   :  { %v491_v44 = vpop.f32.mrb[16].mxu1  ;;  %v588_v45 = vpop.f32.mrb[16].mxu0 }
 0x15b   :  { %v589_v46 = vadd.f32 %v588_v45, %v491_v44  ;;  %v493_v47 = vpop.f32.mrb[17].mxu1  ;;  %v590_v48 = vpop.f32.mrb[17].mxu0 }
 0x15c   :  { %v494_v49 = vpop.f32.mrb[18].mxu1  ;;  %v591_v50 = vpop.f32.mrb[18].mxu0 }
 0x15d   :  { %v592_v51 = vadd.f32 %v591_v50, %v494_v49  ;;  %v496_v52 = vpop.f32.mrb[19].mxu1  ;;  %v593_v53 = vpop.f32.mrb[19].mxu0 }
 0x15f   :  { %v836_v54 = vpack.c.bf16 %v592_v51, %v589_v46 }
 0x161   :  { %856 = vst [vmem:[#allocation7 + $0x20] sm:$0xff] %v836_v54  }
 0x162   :  { %v499_v55 = vpop.f32.mrb[20].mxu1  ;;  %v596_v56 = vpop.f32.mrb[20].mxu0 }
 0x163   :  { %v597_v57 = vadd.f32 %v596_v56, %v499_v55  ;;  %v501_v58 = vpop.f32.mrb[21].mxu1  ;;  %v598_v59 = vpop.f32.mrb[21].mxu0 }
 0x164   :  { %v502_v60 = vpop.f32.mrb[22].mxu1  ;;  %v599_v61 = vpop.f32.mrb[22].mxu0 }
 0x165   :  { %v600_v62 = vadd.f32 %v599_v61, %v502_v60  ;;  %v504_v63 = vpop.f32.mrb[23].mxu1  ;;  %v601_v0 = vpop.f32.mrb[23].mxu0 }
 0x167   :  { %v841_v1 = vpack.c.bf16 %v600_v62, %v597_v57 }
 0x169   :  { %857 = vst [vmem:[#allocation7 + $0x28] sm:$0xff] %v841_v1  }
 0x16a   :  { %v507_v2 = vpop.f32.mrb[24].mxu1  ;;  %v604_v3 = vpop.f32.mrb[24].mxu0 }
 0x16b   :  { %v605_v4 = vadd.f32 %v604_v3, %v507_v2  ;;  %v509_v5 = vpop.f32.mrb[25].mxu1  ;;  %v606_v6 = vpop.f32.mrb[25].mxu0 }
 0x16c   :  { %v510_v7 = vpop.f32.mrb[26].mxu1  ;;  %v607_v8 = vpop.f32.mrb[26].mxu0 }
 0x16d   :  { %v608_v9 = vadd.f32 %v607_v8, %v510_v7  ;;  %v512_v10 = vpop.f32.mrb[27].mxu1  ;;  %v609_v11 = vpop.f32.mrb[27].mxu0 }
 0x16f   :  { %v846_v12 = vpack.c.bf16 %v608_v9, %v605_v4 }
 0x171   :  { %858 = vst [vmem:[#allocation7 + $0x30] sm:$0xff] %v846_v12  }
 0x172   :  { %v515_v13 = vpop.f32.mrb[28].mxu1  ;;  %v612_v14 = vpop.f32.mrb[28].mxu0 }
 0x173   :  { %v613_v15 = vadd.f32 %v612_v14, %v515_v13  ;;  %v517_v16 = vpop.f32.mrb[29].mxu1  ;;  %v614_v17 = vpop.f32.mrb[29].mxu0 }
 0x174   :  { %v518_v18 = vpop.f32.mrb[30].mxu1  ;;  %v615_v19 = vpop.f32.mrb[30].mxu0 }
 0x175   :  { %v616_v20 = vadd.f32 %v615_v19, %v518_v18  ;;  %v520_v21 = vpop.f32.mrb[31].mxu1  ;;  %v617_v22 = vpop.f32.mrb[31].mxu0 }
 0x177   :  { %v851_v23 = vpack.c.bf16 %v616_v20, %v613_v15 }
 0x179   :  { %859 = vst [vmem:[#allocation7 + $0x38] sm:$0xff] %v851_v23  }
 0x17a   :  { %1034 = shalt.err (!%p1031_p6)
}
 0x17b   :  { %s1035_s10 = scalar_lea.hbm %s1111_s2, 1024 }
 0x17c   :  { %p1036_p7 = scmp.ne.s32.totalorder %s1111_s2, %s1035_s10  ;;  %p1039_p8 = scmp.lt.u32.totalorder %s1035_s10, %s1111_s2 }
 0x17e   :  { %p1041_p9 = pnand %p1039_p8, %p1036_p7 }
 0x180   :  { %1044 = shalt.err (!%p1041_p9)
}
 0x181   :  { %s1056_s15 = smov 64   ;;  %s1057_s16 = smov 4  }
 0x182   :  { %710 = dma.vmem_to_hbm [thread:$0]  %s705_s6, 1024, %s1111_s2, [#allocation4], %s1056_s15, %s1056_s15, %s1057_s16  }
 0x183   :  { %1049 = dma.done.wait [#allocation4], 1024  }
 0x184   :  { %1050 = vsyncadd [#allocation4], 4294966272 }
 0x185   :  { %714 = vsyncpa [#allocation3], 1 }
 0x186   :  { %715 = vsyncpa [#allocation6], 1 }
 0x187   :  { %716 = vsyncpa [#allocation4], 1 }

</bundles_post_ra>
